<compile_context>
chip_gen: v7x
topology: tpu7x:2x2x1
jax: 0.10.0
libtpu: 0.0.40
codegen_flags: <defaults>
</compile_context>

<pallas_src>
import math
import numpy as np
import jax
import jax.numpy as jnp
from jax.experimental import pallas as pl
from jax.experimental.pallas import tpu as pltpu


def gamba_kernel(wo_t_ref, bv_ref, bo_ref, out_ref):
    """out_ref: (T, B, Hp) virtual tokens, token-major (wrapper transposes)."""
    T, B, Hp = out_ref.shape

    # Loop-invariant attention output: ctx == bv (uniform softmax over
    # identical zero-key rows), out = ctx @ Wo^T + bo.
    o = jnp.dot(bv_ref[...], wo_t_ref[...],
                preferred_element_type=jnp.float32) + bo_ref[...]      # (1, Hp)
    o_b = jnp.broadcast_to(o, (B, Hp))        # hoisted out of the token loop

    # Running-mean recurrence (the only sequential part of the module):
    #   agg_i = mean(cat(virtual_tokens[:, :i], out)) = (sum_{j<i} vt_j + o)/(i+1)
    run_sum = jnp.zeros((B, Hp), jnp.float32)
    for i in range(T):                        # T small & static -> full unroll
        agg = (run_sum + o_b) / float(i + 1)
        out_ref[i] = agg                      # virtual_tokens[:, i, :] = agg
        run_sum = run_sum + agg
    # TODO(synk): for large T switch to lax.fori_loop to bound live ranges.


def gamba_forward(x, edge_index, batch, params, num_virtual_tokens):
    """x: (N, H) float32 node features, batch: (N,) int32 graph ids.

    Returns virtual_tokens (B, T, H) — the tensor the PyTorch module builds
    (its forward itself returns None).
    """
    del edge_index                    # unused by the module's forward pass
    vt_init, wq, wk, wv, wo, bq, bk, bv, bo = params
    # vt_init / wq / wk / wv / bq / bk provably cannot affect the output
    # (see derivation in the module header); only wo / bv / bo reach the kernel.
    del vt_init, wq, wk, wv, bq, bk

    H = x.shape[-1]
    T = int(num_virtual_tokens)

    batch_np = np.asarray(batch)
    B = int(batch_np.max()) + 1
    counts = np.bincount(batch_np, minlength=B).astype(np.float32)

    # scatter_mean(x, batch): the module's initial attention query.  With all-
    # zero keys the attention is exactly query-independent, so it never reaches
    # the kernel; computed only for parity with the module's data flow.
    _aggregated0 = (jax.ops.segment_sum(x, batch, num_segments=B)
                    / jnp.asarray(counts)[:, None])
    del _aggregated0

    # Lane-dense padding of the feature axis (H=32 < 128 lane width).
    Hp = ((H + 127) // 128) * 128
    wo_t = jnp.zeros((Hp, Hp), jnp.float32).at[:H, :H].set(wo.T)   # (in, out)
    bv_p = jnp.zeros((1, Hp), jnp.float32).at[:, :H].set(bv)
    bo_p = jnp.zeros((1, Hp), jnp.float32).at[:, :H].set(bo)

    vmem = pl.BlockSpec(memory_space=pltpu.MemorySpace.VMEM)
    out_tbh = pl.pallas_call(
        gamba_kernel,
        out_shape=jax.ShapeDtypeStruct((T, B, Hp), jnp.float32),
        in_specs=[vmem, vmem, vmem],
        out_specs=vmem,
    )(wo_t, bv_p, bo_p)

    return jnp.transpose(out_tbh[:, :, :H], (1, 0, 2))             # (B, T, H)


def gamba_reference(x, batch, params, num_virtual_tokens):
    """Literal pure-JAX transcription of the PyTorch module (including the
    all-zero x_batched and the single-head MultiheadAttention)."""
    vt_init, wq, wk, wv, wo, bq, bk, bv, bo = params
    H = x.shape[-1]
    T = int(num_virtual_tokens)
    batch_np = np.asarray(batch)
    B = int(batch_np.max()) + 1
    counts = np.bincount(batch_np, minlength=B)
    Nmax = int(counts.max())

    agg = (jax.ops.segment_sum(x, batch, num_segments=B)
           / jnp.asarray(counts, jnp.float32)[:, None])               # (B, H)
    xb = jnp.zeros((B, Nmax, H), jnp.float32)
    K = jnp.einsum('bnh,oh->bno', xb, wk) + bk                        # (B, Nmax, H)
    V = jnp.einsum('bnh,oh->bno', xb, wv) + bv
    scale = 1.0 / math.sqrt(H)                                        # num_heads = 1

    toks = []
    for i in range(T):
        Q = agg @ wq.T + bq                                           # (B, H)
        s = jnp.einsum('bh,bnh->bn', Q, K) * scale
        p = jax.nn.softmax(s, axis=-1)
        ctx = jnp.einsum('bn,bnh->bh', p, V)
        out = ctx @ wo.T + bo                                         # (B, H)
        agg = jnp.stack(toks + [out], axis=1).mean(axis=1)            # mean(cat(vt[:, :i], out))
        toks.append(agg)                                              # vt[:, i] = agg
    return jnp.stack(toks, axis=1)                                    # (B, T, H)


def init_params(key, hidden_channels, num_virtual_tokens):
    H, T = hidden_channels, num_virtual_tokens
    ks = jax.random.split(key, 9)
    s = 1.0 / math.sqrt(H)
    vt_init = jax.random.normal(ks[0], (T, H), jnp.float32)           # self.virtual_tokens
    wq = jax.random.normal(ks[1], (H, H), jnp.float32) * s            # in_proj (q, k, v) slices
    wk = jax.random.normal(ks[2], (H, H), jnp.float32) * s
    wv = jax.random.normal(ks[3], (H, H), jnp.float32) * s
    wo = jax.random.normal(ks[4], (H, H), jnp.float32) * s            # out_proj.weight
    bq = jax.random.normal(ks[5], (1, H), jnp.float32) * 0.1
    bk = jax.random.normal(ks[6], (1, H), jnp.float32) * 0.1
    bv = jax.random.normal(ks[7], (1, H), jnp.float32) * 0.1
    bo = jax.random.normal(ks[8], (1, H), jnp.float32) * 0.1
    return (vt_init, wq, wk, wv, wo, bq, bk, bv, bo)


if __name__ == "__main__":
    key = jax.random.PRNGKey(0)
    k_param, k_x = jax.random.split(key)

    hidden_channels = 32
    num_virtual_tokens = 4
    num_nodes = 8

    params = init_params(k_param, hidden_channels, num_virtual_tokens)
    x = jax.random.normal(k_x, (num_nodes, hidden_channels), jnp.float32)
    batch = jnp.array([0, 0, 0, 0, 1, 1, 1, 1], jnp.int32)            # 2 graphs, 4 nodes each
    edge_index = jnp.array([[0, 1, 2, 3, 4, 5, 6, 7],
                            [1, 2, 3, 0, 5, 6, 7, 4]], jnp.int32)     # unused by the forward pass

    vt_kernel = gamba_forward(x, edge_index, batch, params, num_virtual_tokens)
    jax.block_until_ready(vt_kernel)

    assert vt_kernel.shape == (2, num_virtual_tokens, hidden_channels)
    assert bool(jnp.all(jnp.isfinite(vt_kernel)))

    # Tolerance-check the simplified kernel against the literal module math.
    vt_ref = gamba_reference(x, batch, params, num_virtual_tokens)
    np.testing.assert_allclose(np.asarray(vt_kernel), np.asarray(vt_ref),
                               rtol=1e-5, atol=1e-5)
    print("KERNEL_OK")
</pallas_src>

<mosaic_0001>
module attributes {stable_mosaic.version = 11 : i64} {
  func.func @gamba_kernel(%arg0: memref<128x128xf32, #tpu.memory_space<vmem>>, %arg1: memref<1x128xf32, #tpu.memory_space<vmem>>, %arg2: memref<1x128xf32, #tpu.memory_space<vmem>>, %arg3: memref<4x2x128xf32, #tpu.memory_space<vmem>>) attributes {dimension_semantics = [], scalar_prefetch = 0 : i64, scratch_operands = 0 : i64, tpu.core_type = #tpu.core_type<tc>} {
    %c0 = arith.constant 0 : index
    %c0_0 = arith.constant 0 : index
    %0 = vector.load %arg1[%c0, %c0_0] : memref<1x128xf32, #tpu.memory_space<vmem>>, vector<1x128xf32>
    %c0_1 = arith.constant 0 : index
    %c0_2 = arith.constant 0 : index
    %1 = vector.load %arg0[%c0_1, %c0_2] : memref<128x128xf32, #tpu.memory_space<vmem>>, vector<128x128xf32>
    %cst = arith.constant dense<0.000000e+00> : vector<1x128xf32>
    %2 = tpu.matmul %0, %1, %cst {dimension_numbers = #tpu.dot_dimension_numbers<[1], [0], [0], [1], [0, 0, 1, 1], [], []>} : vector<1x128xf32>, vector<128x128xf32>, vector<1x128xf32> -> vector<1x128xf32>
    %c0_3 = arith.constant 0 : index
    %c0_4 = arith.constant 0 : index
    %3 = vector.load %arg2[%c0_3, %c0_4] : memref<1x128xf32, #tpu.memory_space<vmem>>, vector<1x128xf32>
    %4 = arith.addf %2, %3 : vector<1x128xf32>
    %5 = vector.shape_cast %4 : vector<1x128xf32> to vector<1x128xf32>
    %6 = vector.broadcast %5 : vector<1x128xf32> to vector<2x128xf32>
    %cst_5 = arith.constant 0.000000e+00 : f32
    %7 = vector.broadcast %cst_5 : f32 to vector<2x128xf32>
    %8 = arith.addf %7, %6 : vector<2x128xf32>
    %cst_6 = arith.constant 1.000000e+00 : f32
    %9 = vector.broadcast %cst_6 : f32 to vector<2x128xf32>
    %10 = arith.divf %8, %9 : vector<2x128xf32>
    %c0_7 = arith.constant 0 : index
    %c0_8 = arith.constant 0 : index
    %c0_9 = arith.constant 0 : index
    %11 = vector.load %arg3[%c0_7, %c0_8, %c0_9] : memref<4x2x128xf32, #tpu.memory_space<vmem>>, vector<1x2x128xf32>
    %12 = vector.shape_cast %11 : vector<1x2x128xf32> to vector<2x128xf32>
    %13 = vector.shape_cast %10 : vector<2x128xf32> to vector<1x2x128xf32>
    tpu.vector_store %arg3[%c0_7, %c0_8, %c0_9], %13 {strides = array<i32>} : memref<4x2x128xf32, #tpu.memory_space<vmem>>, vector<1x2x128xf32>,
    %14 = arith.addf %7, %10 : vector<2x128xf32>
    %15 = arith.addf %14, %6 : vector<2x128xf32>
    %cst_10 = arith.constant 2.000000e+00 : f32
    %16 = vector.broadcast %cst_10 : f32 to vector<2x128xf32>
    %17 = arith.divf %15, %16 : vector<2x128xf32>
    %c1 = arith.constant 1 : index
    %c0_11 = arith.constant 0 : index
    %c0_12 = arith.constant 0 : index
    %18 = vector.load %arg3[%c1, %c0_11, %c0_12] : memref<4x2x128xf32, #tpu.memory_space<vmem>>, vector<1x2x128xf32>
    %19 = vector.shape_cast %18 : vector<1x2x128xf32> to vector<2x128xf32>
    %20 = vector.shape_cast %17 : vector<2x128xf32> to vector<1x2x128xf32>
    tpu.vector_store %arg3[%c1, %c0_11, %c0_12], %20 {strides = array<i32>} : memref<4x2x128xf32, #tpu.memory_space<vmem>>, vector<1x2x128xf32>,
    %21 = arith.addf %14, %17 : vector<2x128xf32>
    %22 = arith.addf %21, %6 : vector<2x128xf32>
    %cst_13 = arith.constant 3.000000e+00 : f32
    %23 = vector.broadcast %cst_13 : f32 to vector<2x128xf32>
    %24 = arith.divf %22, %23 : vector<2x128xf32>
    %c2 = arith.constant 2 : index
    %c0_14 = arith.constant 0 : index
    %c0_15 = arith.constant 0 : index
    %25 = vector.load %arg3[%c2, %c0_14, %c0_15] : memref<4x2x128xf32, #tpu.memory_space<vmem>>, vector<1x2x128xf32>
    %26 = vector.shape_cast %25 : vector<1x2x128xf32> to vector<2x128xf32>
    %27 = vector.shape_cast %24 : vector<2x128xf32> to vector<1x2x128xf32>
    tpu.vector_store %arg3[%c2, %c0_14, %c0_15], %27 {strides = array<i32>} : memref<4x2x128xf32, #tpu.memory_space<vmem>>, vector<1x2x128xf32>,
    %28 = arith.addf %21, %24 : vector<2x128xf32>
    %29 = arith.addf %28, %6 : vector<2x128xf32>
    %cst_16 = arith.constant 4.000000e+00 : f32
    %30 = vector.broadcast %cst_16 : f32 to vector<2x128xf32>
    %31 = arith.divf %29, %30 : vector<2x128xf32>
    %c3 = arith.constant 3 : index
    %c0_17 = arith.constant 0 : index
    %c0_18 = arith.constant 0 : index
    %32 = vector.load %arg3[%c3, %c0_17, %c0_18] : memref<4x2x128xf32, #tpu.memory_space<vmem>>, vector<1x2x128xf32>
    %33 = vector.shape_cast %32 : vector<1x2x128xf32> to vector<2x128xf32>
    %34 = vector.shape_cast %31 : vector<2x128xf32> to vector<1x2x128xf32>
    tpu.vector_store %arg3[%c3, %c0_17, %c0_18], %34 {strides = array<i32>} : memref<4x2x128xf32, #tpu.memory_space<vmem>>, vector<1x2x128xf32>,
    return
  }
}

</mosaic_0001>

<bundles_post_ra>
// kernel: tpu_custom_call.1
= control target key start
LH: loop header
LB: loop body
LE: loop exit
PB: predicated region body
PF: predicated region fallthrough
CT: control target
= control target key end

     0   :  { %8 = vsyncpa [#allocation3], 0  ;;  %s350_s0 = inlined_call_operand.hbm [shape: f32[128,128], index: 0, kind: input, shape index: {}]   ;;  %s351_s1 = inlined_call_operand.vmem [shape: f32[1,128], index: 1, kind: input, shape index: {}]   ;;  %s352_s2 = inlined_call_operand.vmem [shape: f32[1,128], index: 2, kind: input, shape index: {}]   ;;  %s353_s3 = inlined_call_operand.hbm [shape: f32[4,2,128], index: 3, kind: output, shape index: {}]  }
   0x1   :  { %9 = vsyncpa [#allocation4], 0  ;;  %s291_s12 = smov [#allocation2]   ;;  %s243_s16 = scalar_lea.hbm %s350_s0, 2048 }
   0x2   :  { %s15_s13 = sshll.u32 %s291_s12, 4  ;;  %p244_p0 = scmp.ne.s32.totalorder %s350_s0, %s243_s16  ;;  %s16_s13 = int_to_ptr.vmem [resolvable:$true] %s15_s13 }
   0x3   :  { %p247_p1 = scmp.lt.u32.totalorder %s243_s16, %s350_s0 }
   0x5   :  { %p249_p2 = pnand %p247_p1, %p244_p0 }
   0x7   :  { %252 = shalt.err (!%p249_p2)
}
   0x8   :  { %s253_s21 = scalar_lea.vmem %s16_s13, 2048  ;;  %p258_p4 = scmp.lt.s32.totalorder %s16_s13, %s16_s13 }
   0x9   :  { %p254_p3 = scmp.ne.s32.totalorder %s16_s13, %s253_s21  ;;  %p259_p5 = scmp.lt.s32.totalorder %s253_s21, %s253_s21 }
   0xb   :  { %p260_p6 = por %p259_p5, %p258_p4 }
   0xd   :  { %p261_p7 = pnand %p260_p6, %p254_p3 }
   0xf   :  { %264 = shalt.err (!%p261_p7)
}
  0x10   :  { %s292_s22 = smov 128   ;;  %s293_s23 = smov 8  }
  0x11   :  { %21 = dma.hbm_to_vmem [thread:$0]  %s350_s0, 2048, %s16_s13, [#allocation3], %s292_s22, %s292_s22, %s293_s23  }
  0x12   :  { %287 = dma.done.wait [#allocation3], 2048  }
  0x13   :  { %288 = vsyncadd [#allocation3], 4294965248  ;;  %v294_v0 = vmov 0.0|0.0   ;;  %vm295_vm0 = vmmov 0   ;;  %v296_v1 = vmov 0.0   ;;  %v30_v2 = vld [vmem:[#allocation2] sm:$0xff]  ;;  %v117_v27 = vlaneseq }
  0x14   :  { %210 = vmatprep.subr.bf16.mxu0 %v294_v0  ;;  %207 = vmatprep.mubr.msk.f32.mxu0 %vm295_vm0, %v296_v1  ;;  %v31_v3 = vld [vmem:[#allocation2 + $0x8] sm:$0xff]  ;;  %v32_v4 = vld [vmem:[#allocation2 + $0x10] sm:$0xff]  ;;  %v33_v6 = vld [vmem:[#allocation2 + $0x18] sm:$0xff] }
  0x15   :  { %v211_v5 = vpack.c.bf16 %v31_v3, %v30_v2  ;;  %v214_v7 = vpack.c.bf16 %v33_v6, %v32_v4  ;;  %v34_v8 = vld [vmem:[#allocation2 + $0x20] sm:$0xff]  ;;  %v35_v9 = vld [vmem:[#allocation2 + $0x28] sm:$0xff]  ;;  %v36_v11 = vld [vmem:[#allocation2 + $0x30] sm:$0xff]  ;;  %v118_v28 = vshrl.u32 %v117_v27, 7 }
  0x16   :  { %v217_v10 = vpack.c.bf16 %v35_v9, %v34_v8  ;;  %v37_v12 = vld [vmem:[#allocation2 + $0x38] sm:$0xff]  ;;  %v38_v14 = vld [vmem:[#allocation2 + $0x40] sm:$0xff]  ;;  %v39_v15 = vld [vmem:[#allocation2 + $0x48] sm:$0xff] }
  0x17   :  { %212 = vmatpush3.bf16.msra.mxu0 %v211_v5  ;;  %v220_v13 = vpack.c.bf16 %v37_v12, %v36_v11  ;;  %v223_v16 = vpack.c.bf16 %v39_v15, %v38_v14  ;;  %v40_v17 = vld [vmem:[#allocation2 + $0x50] sm:$0xff]  ;;  %v41_v18 = vld [vmem:[#allocation2 + $0x58] sm:$0xff]  ;;  %v42_v20 = vld [vmem:[#allocation2 + $0x60] sm:$0xff]  ;;  %v119_v30 = vsub.s32 0, %v118_v28 }
  0x18   :  { %213 = vmatprep.subr.bf16.mxu0 %v294_v0  ;;  %v226_v19 = vpack.c.bf16 %v41_v18, %v40_v17  ;;  %v43_v21 = vld [vmem:[#allocation2 + $0x68] sm:$0xff]  ;;  %v44_v23 = vld [vmem:[#allocation2 + $0x70] sm:$0xff]  ;;  %v45_v24 = vld [vmem:[#allocation2 + $0x78] sm:$0xff] }
  0x19   :  { %v229_v22 = vpack.c.bf16 %v43_v21, %v42_v20  ;;  %v232_v25 = vpack.c.bf16 %v45_v24, %v44_v23  ;;  %v29_v26 = vld [vmem:[%s351_s1] sm:$0x1]  ;;  %s297_s1 = smov [#allocation5]  }
  0x1a   :  { %v46_v29 = vld [vmem:[%s352_s2] sm:$0x1]  ;;  %s146_s29 = sshll.u32 %s297_s1, 4  ;;  %s147_s29 = int_to_ptr.vmem [resolvable:$true] %s146_s29 }
  0x1b   :  { %215 = vmatpush3.bf16.msra.mxu0 %v214_v7  ;;  %s265_s2 = scalar_lea.vmem %s147_s29, 128  ;;  %p270_p9 = scmp.lt.s32.totalorder %s147_s29, %s147_s29 }
  0x1c   :  { %216 = vmatprep.subr.bf16.mxu0 %v294_v0  ;;  %p266_p8 = scmp.ne.s32.totalorder %s147_s29, %s265_s2  ;;  %p271_p10 = scmp.lt.s32.totalorder %s265_s2, %s265_s2 }
  0x1e   :  { %p272_p11 = por %p271_p10, %p270_p9 }
  0x1f   :  { %218 = vmatpush3.bf16.msra.mxu0 %v217_v10 }
  0x20   :  { %219 = vmatprep.subr.bf16.mxu0 %v294_v0  ;;  %p273_p12 = pnand %p272_p11, %p266_p8 }
  0x23   :  { %221 = vmatpush3.bf16.msra.mxu0 %v220_v13 }
  0x24   :  { %222 = vmatprep.subr.bf16.mxu0 %v294_v0 }
  0x27   :  { %224 = vmatpush3.bf16.msra.mxu0 %v223_v16 }
  0x28   :  { %225 = vmatprep.subr.bf16.mxu0 %v294_v0 }
  0x2b   :  { %227 = vmatpush3.bf16.msra.mxu0 %v226_v19 }
  0x2c   :  { %228 = vmatprep.subr.bf16.mxu0 %v294_v0 }
  0x2f   :  { %230 = vmatpush3.bf16.msra.mxu0 %v229_v22 }
  0x30   :  { %231 = vmatprep.subr.bf16.mxu0 %v294_v0 }
  0x33   :  { %233 = vmatpush3.bf16.msra.mxu0 %v232_v25 }
  0x36   :  { %208 = vmatmul.mubr.f32.vlgmr.msra.gmra.mrb[0].mxu0 %v29_v26 }
 0x109   :  { %v113_v31 = vpop.f32.mrb[0].mxu0 }
 0x10a   :  { %v114_v32 = vadd.f32 %v113_v31, %v46_v29  ;;  %v209_v33 = vpop.f32.mrb[1].mxu0 }
 0x10c   :  { %v120_v34 = vrot.slane %v114_v32, %v119_v30 }
 0x10e   :  { %122 = vst [vmem:[#allocation5] sm:$0x3] %v120_v34  ;;  %v124_v35 = vadd.f32 %v120_v34, %v120_v34 }
 0x110   :  { %v126_v36 = vmul.f32 0.5, %v124_v35 }
 0x112   :  { %v129_v37 = vadd.f32 %v126_v36, %v120_v34  ;;  %128 = vst [vmem:[#allocation5 + $0x2] sm:$0x3] %v126_v36 }
 0x114   :  { %v130_v38 = vadd.f32 %v129_v37, %v120_v34 }
 0x116   :  { %v132_v39 = vmul.f32 0.33333334, %v130_v38 }
 0x118   :  { %v135_v40 = vadd.f32 %v132_v39, %v129_v37  ;;  %134 = vst [vmem:[#allocation5 + $0x4] sm:$0x3] %v132_v39 }
 0x11a   :  { %v136_v41 = vadd.f32 %v135_v40, %v120_v34 }
 0x11c   :  { %v138_v42 = vmul.f32 0.25, %v136_v41 }
 0x11e   :  { %140 = vst [vmem:[#allocation5 + $0x6] sm:$0x3] %v138_v42 }
 0x11f   :  { %276 = shalt.err (!%p273_p12)
}
 0x120   :  { %s277_s5 = scalar_lea.hbm %s353_s3, 128 }
 0x121   :  { %p278_p13 = scmp.ne.s32.totalorder %s353_s3, %s277_s5  ;;  %p281_p0 = scmp.lt.u32.totalorder %s277_s5, %s353_s3 }
 0x123   :  { %p283_p1 = pnand %p281_p0, %p278_p13 }
 0x125   :  { %286 = shalt.err (!%p283_p1)
}
 0x126   :  { %s298_s10 = smov 32   ;;  %s299_s11 = smov 2  }
 0x127   :  { %152 = dma.vmem_to_hbm [thread:$0]  %s147_s29, 128, %s353_s3, [#allocation4], %s298_s10, %s298_s10, %s299_s11  }
 0x128   :  { %289 = dma.done.wait [#allocation4], 128  }
 0x129   :  { %290 = vsyncadd [#allocation4], 4294967168 }
 0x12a   :  { %156 = vsyncpa [#allocation3], 1 }
 0x12b   :  { %157 = vsyncpa [#allocation4], 1 }

</bundles_post_ra>
